<compile_context>
chip_gen: v6e
topology: v6e:2x2x1
jax: 0.10.0
libtpu: 0.0.40
codegen_flags: <defaults>
</compile_context>

<pallas_src>
import jax
import jax.numpy as jnp
from jax.experimental import pallas as pl
from jax.experimental.pallas import tpu as pltpu

BN_EPS = 1e-5

FUSED_FOOTPRINT_BUDGET = 24 << 20   # x + out bytes allowed for the resident-x path
FUSED_VMEM_LIMIT = 48 << 20         # < v7x physical 64 MiB, leaves headroom
STREAM_TILE_BUDGET = 8 << 20        # double-buffered in+out tile budget (streamed path)
STREAM_VMEM_LIMIT = 32 << 20        # explicit scoped-VMEM limit (v5e default is 16 MiB)


def _pick_hw_tile(hw, c_in, c_out, budget_bytes=STREAM_TILE_BUDGET):
    """Largest lane-friendly tile for the streamed path, sized to a VMEM budget."""
    per_lane = (c_in + c_out) * 4 * 2           # f32 in + out columns, double-buffered
    cap = (budget_bytes // per_lane) // 128 * 128
    cap = max(128, min(cap, 32768))
    if hw <= cap:
        return hw                                # block == full dim is always legal
    for cand in range(cap, 127, -128):           # prefer an exact divisor (no masking)
        if hw % cand == 0:
            return cand
    return cap                                   # cdiv grid + masked last tile


def recovery_conv4(x, conv_weight, bn_gamma, bn_beta, eps=BN_EPS, force_streamed=False):
    """x: (N, C_in, H, W) NCHW. conv_weight: (C_out, C_in, 1, 1). Returns NCHW."""
    N, C_in, H, W = x.shape
    C_out = conv_weight.shape[0]
    HW = H * W
    M = N * HW

    # Free reshapes (contiguous) -- no transposes.
    x3 = x.reshape(N, C_in, HW).astype(jnp.float32)
    w = conv_weight.reshape(C_out, C_in).astype(jnp.float32)
    gamma2 = bn_gamma.reshape(C_out, 1).astype(jnp.float32)
    beta2 = bn_beta.reshape(C_out, 1).astype(jnp.float32)

    x_bytes = N * C_in * HW * 4
    out_bytes = N * C_out * HW * 4
    fused_ok = (x_bytes + out_bytes) <= FUSED_FOOTPRINT_BUDGET and not force_streamed

    # ------------------------------------------------------------------
    # FUSED path: x resident in VMEM, stats + BN fold + apply in one call.
    # ------------------------------------------------------------------
    if fused_ok:

        def fused_kernel(x_ref, w_ref, g_ref, b_ref, o_ref):
            w_f = w_ref[...]                                   # (C_out, C_in)

            # --- stats phase: Gram accumulation on the MXU ---
            gram = jnp.zeros((C_in, C_in), jnp.float32)
            s = jnp.zeros((C_in, 1), jnp.float32)
            for n in range(N):                                 # N is small & static
                xn = x_ref[n]                                  # (C_in, HW)
                gram = gram + jax.lax.dot_general(
                    xn, xn, (((1,), (1,)), ((), ())),
                    preferred_element_type=jnp.float32)
                s = s + jnp.sum(xn, axis=1, keepdims=True)

            # --- BN fold (C_out-sized scalar math, done in-kernel) ---
            mean = jnp.dot(w_f, s, preferred_element_type=jnp.float32) / M      # (C_out,1)
            wg = jnp.dot(w_f, gram, preferred_element_type=jnp.float32)         # (C_out,C_in)
            e_y2 = jnp.sum(wg * w_f, axis=1, keepdims=True) / M                 # (C_out,1)
            var = jnp.maximum(e_y2 - mean * mean, 0.0)                          # biased var
            inv_std = jax.lax.rsqrt(var + eps)
            scale = g_ref[...] * inv_std                                         # (C_out,1)
            bias = b_ref[...] - mean * scale                                     # (C_out,1)
            w_scaled = scale * w_f                                               # (C_out,C_in)

            # --- apply phase: out = (scale*W) @ x + bias ---
            for n in range(N):
                y = jnp.dot(w_scaled, x_ref[n], preferred_element_type=jnp.float32)
                o_ref[n] = (y + bias).astype(o_ref.dtype)

        out3 = pl.pallas_call(
            fused_kernel,
            out_shape=jax.ShapeDtypeStruct((N, C_out, HW), x.dtype),
            compiler_params=pltpu.CompilerParams(vmem_limit_bytes=FUSED_VMEM_LIMIT),
        )(x3, w, gamma2, beta2)
        return out3.reshape(N, C_out, H, W)

    # ------------------------------------------------------------------
    # STREAMED fallback: two passes, large lane-dense tiles.
    # ------------------------------------------------------------------
    hw_tile = _pick_hw_tile(HW, C_in, C_out)
    T = pl.cdiv(HW, hw_tile)
    needs_mask = (HW % hw_tile) != 0

    # ----- Pass 1: per-batch Gram (C_in x C_in) + per-channel input sums -----
    def stats_kernel(x_ref, g_ref, s_ref):
        @pl.when(pl.program_id(1) == 0)
        def _init():
            g_ref[...] = jnp.zeros_like(g_ref)
            s_ref[...] = jnp.zeros_like(s_ref)

        xt = x_ref[0]                                          # (C_in, hw_tile)
        if needs_mask:
            col = (pl.program_id(1) * hw_tile
                   + jax.lax.broadcasted_iota(jnp.int32, (1, hw_tile), 1))
            xt = jnp.where(col < HW, xt, 0.0)
        gram = jax.lax.dot_general(xt, xt, (((1,), (1,)), ((), ())),
                                   preferred_element_type=jnp.float32)
        g_ref[...] += gram[None]
        s_ref[...] += jnp.sum(xt, axis=1, keepdims=True)[None]

    g_parts, s_parts = pl.pallas_call(
        stats_kernel,
        out_shape=(
            jax.ShapeDtypeStruct((N, C_in, C_in), jnp.float32),
            jax.ShapeDtypeStruct((N, C_in, 1), jnp.float32),
        ),
        grid=(N, T),
        in_specs=[pl.BlockSpec((1, C_in, hw_tile), lambda n, t: (n, 0, t))],
        out_specs=[
            pl.BlockSpec((1, C_in, C_in), lambda n, t: (n, 0, 0)),
            pl.BlockSpec((1, C_in, 1), lambda n, t: (n, 0, 0)),
        ],
        compiler_params=pltpu.CompilerParams(
            dimension_semantics=("parallel", "arbitrary"),
            vmem_limit_bytes=STREAM_VMEM_LIMIT,
        ),
    )(x3)

    # Tiny per-channel math in plain JAX.
    G = jnp.sum(g_parts, axis=0)                        # (C_in, C_in)
    s = jnp.sum(s_parts, axis=0)                        # (C_in, 1)
    mean = (w @ s) / M                                  # (C_out, 1)
    e_y2 = jnp.sum((w @ G) * w, axis=1, keepdims=True) / M
    var = jnp.maximum(e_y2 - mean * mean, 0.0)          # biased variance (training BN)
    inv_std = jax.lax.rsqrt(var + eps)
    scale = gamma2 * inv_std                            # (C_out, 1)
    bias = beta2 - mean * scale                         # (C_out, 1)
    w_scaled = scale * w                                # (C_out, C_in)

    # ----- Pass 2: out = (scale*W) @ x + bias, fully parallel tiles -----
    def apply_kernel(x_ref, ws_ref, b_ref, o_ref):
        y = jnp.dot(ws_ref[...], x_ref[0], preferred_element_type=jnp.float32)
        o_ref[...] = (y + b_ref[...])[None].astype(o_ref.dtype)

    out3 = pl.pallas_call(
        apply_kernel,
        out_shape=jax.ShapeDtypeStruct((N, C_out, HW), x.dtype),
        grid=(N, T),
        in_specs=[
            pl.BlockSpec((1, C_in, hw_tile), lambda n, t: (n, 0, t)),
            pl.BlockSpec((C_out, C_in), lambda n, t: (0, 0)),
            pl.BlockSpec((C_out, 1), lambda n, t: (0, 0)),
        ],
        out_specs=pl.BlockSpec((1, C_out, hw_tile), lambda n, t: (n, 0, t)),
        compiler_params=pltpu.CompilerParams(
            dimension_semantics=("parallel", "parallel"),
            vmem_limit_bytes=STREAM_VMEM_LIMIT,
        ),
    )(x3, w_scaled, bias)

    return out3.reshape(N, C_out, H, W)


def reference_jax(x, conv_weight, bn_gamma, bn_beta):
    """Pure-JAX reference (centered two-pass BN) for correctness check."""
    C_out = conv_weight.shape[0]
    C_in = conv_weight.shape[1]
    w = conv_weight.reshape(C_out, C_in)
    y = jnp.einsum("nchw,oc->nohw", x.astype(jnp.float32), w.astype(jnp.float32))
    mean = jnp.mean(y, axis=(0, 2, 3), keepdims=True)
    var = jnp.mean((y - mean) ** 2, axis=(0, 2, 3), keepdims=True)
    yhat = (y - mean) / jnp.sqrt(var + BN_EPS)
    return yhat * bn_gamma.reshape(1, C_out, 1, 1) + bn_beta.reshape(1, C_out, 1, 1)


if __name__ == "__main__":
    # Module config: in_channels=16, recovery_ratio=0.5 -> out_channels=8
    in_channels = 16
    recovery_ratio = 0.5
    out_channels = int(in_channels * recovery_ratio)

    key = jax.random.PRNGKey(0)
    kx, kw = jax.random.split(key)

    N, H, W = 2, 16, 16
    x = jax.random.normal(kx, (N, in_channels, H, W), dtype=jnp.float32)

    # Deterministic parameter init (synthetic; shapes from the module __init__)
    conv_weight = 0.1 * jax.random.normal(
        kw, (out_channels, in_channels, 1, 1), dtype=jnp.float32
    )
    bn_gamma = jnp.ones((out_channels,), dtype=jnp.float32)   # PyTorch BN defaults
    bn_beta = jnp.zeros((out_channels,), dtype=jnp.float32)

    ref = reference_jax(x, conv_weight, bn_gamma, bn_beta)

    # Primary (fused, resident-x) path.
    out = recovery_conv4(x, conv_weight, bn_gamma, bn_beta)
    jax.block_until_ready(out)
    assert out.shape == (N, out_channels, H, W)
    assert jnp.allclose(out, ref, atol=1e-4, rtol=1e-4), "fused path mismatch vs reference"

    # Also exercise the streamed (large-input) fallback path at the same shape.
    out_s = recovery_conv4(x, conv_weight, bn_gamma, bn_beta, force_streamed=True)
    jax.block_until_ready(out_s)
    assert jnp.allclose(out_s, ref, atol=1e-4, rtol=1e-4), "streamed path mismatch vs reference"

    print("KERNEL_OK")
</pallas_src>

<mosaic_0001>
module attributes {stable_mosaic.version = 11 : i64} {
  func.func @fused_kernel(%arg0: memref<2x16x256xf32, #tpu.memory_space<vmem>>, %arg1: memref<8x16xf32, #tpu.memory_space<vmem>>, %arg2: memref<8x1xf32, #tpu.memory_space<vmem>>, %arg3: memref<8x1xf32, #tpu.memory_space<vmem>>, %arg4: memref<2x8x256xf32, #tpu.memory_space<vmem>>) attributes {dimension_semantics = [], scalar_prefetch = 0 : i64, scratch_operands = 0 : i64, tpu.core_type = #tpu.core_type<tc>} {
    %c0 = arith.constant 0 : index
    %c0_0 = arith.constant 0 : index
    %0 = vector.load %arg1[%c0, %c0_0] : memref<8x16xf32, #tpu.memory_space<vmem>>, vector<8x16xf32>
    %cst = arith.constant 0.000000e+00 : f32
    %1 = vector.broadcast %cst : f32 to vector<16x16xf32>
    %cst_1 = arith.constant 0.000000e+00 : f32
    %2 = vector.broadcast %cst_1 : f32 to vector<16x1xf32>
    %c0_2 = arith.constant 0 : index
    %c0_3 = arith.constant 0 : index
    %c0_4 = arith.constant 0 : index
    %3 = vector.load %arg0[%c0_2, %c0_3, %c0_4] : memref<2x16x256xf32, #tpu.memory_space<vmem>>, vector<1x16x256xf32>
    %4 = vector.shape_cast %3 : vector<1x16x256xf32> to vector<16x256xf32>
    %cst_5 = arith.constant dense<0.000000e+00> : vector<16x16xf32>
    %5 = tpu.matmul %4, %4, %cst_5 {dimension_numbers = #tpu.dot_dimension_numbers<[1], [1], [0], [0], [0, 0, 1, 0], [], []>} : vector<16x256xf32>, vector<16x256xf32>, vector<16x16xf32> -> vector<16x16xf32>
    %6 = arith.addf %1, %5 : vector<16x16xf32>
    %cst_6 = arith.constant dense<0.000000e+00> : vector<16xf32>
    %7 = vector.multi_reduction <add>, %4, %cst_6 [1] : vector<16x256xf32> to vector<16xf32>
    %8 = vector.shape_cast %7 : vector<16xf32> to vector<16x1xf32>
    %9 = arith.addf %2, %8 : vector<16x1xf32>
    %c1 = arith.constant 1 : index
    %c0_7 = arith.constant 0 : index
    %c0_8 = arith.constant 0 : index
    %10 = vector.load %arg0[%c1, %c0_7, %c0_8] : memref<2x16x256xf32, #tpu.memory_space<vmem>>, vector<1x16x256xf32>
    %11 = vector.shape_cast %10 : vector<1x16x256xf32> to vector<16x256xf32>
    %cst_9 = arith.constant dense<0.000000e+00> : vector<16x16xf32>
    %12 = tpu.matmul %11, %11, %cst_9 {dimension_numbers = #tpu.dot_dimension_numbers<[1], [1], [0], [0], [0, 0, 1, 0], [], []>} : vector<16x256xf32>, vector<16x256xf32>, vector<16x16xf32> -> vector<16x16xf32>
    %13 = arith.addf %6, %12 : vector<16x16xf32>
    %cst_10 = arith.constant dense<0.000000e+00> : vector<16xf32>
    %14 = vector.multi_reduction <add>, %11, %cst_10 [1] : vector<16x256xf32> to vector<16xf32>
    %15 = vector.shape_cast %14 : vector<16xf32> to vector<16x1xf32>
    %16 = arith.addf %9, %15 : vector<16x1xf32>
    %cst_11 = arith.constant dense<0.000000e+00> : vector<8x1xf32>
    %17 = tpu.matmul %0, %16, %cst_11 {dimension_numbers = #tpu.dot_dimension_numbers<[1], [0], [0], [1], [0, 0, 1, 1], [], []>} : vector<8x16xf32>, vector<16x1xf32>, vector<8x1xf32> -> vector<8x1xf32>
    %cst_12 = arith.constant 5.120000e+02 : f32
    %18 = vector.broadcast %cst_12 : f32 to vector<8x1xf32>
    %19 = arith.divf %17, %18 : vector<8x1xf32>
    %cst_13 = arith.constant dense<0.000000e+00> : vector<8x16xf32>
    %20 = tpu.matmul %0, %13, %cst_13 {dimension_numbers = #tpu.dot_dimension_numbers<[1], [0], [0], [1], [0, 0, 1, 1], [], []>} : vector<8x16xf32>, vector<16x16xf32>, vector<8x16xf32> -> vector<8x16xf32>
    %21 = arith.mulf %20, %0 : vector<8x16xf32>
    %cst_14 = arith.constant dense<0.000000e+00> : vector<8xf32>
    %22 = vector.multi_reduction <add>, %21, %cst_14 [1] : vector<8x16xf32> to vector<8xf32>
    %23 = vector.shape_cast %22 : vector<8xf32> to vector<8x1xf32>
    %cst_15 = arith.constant 5.120000e+02 : f32
    %24 = vector.broadcast %cst_15 : f32 to vector<8x1xf32>
    %25 = arith.divf %23, %24 : vector<8x1xf32>
    %26 = arith.mulf %19, %19 : vector<8x1xf32>
    %27 = arith.subf %25, %26 : vector<8x1xf32>
    %cst_16 = arith.constant 0.000000e+00 : f32
    %28 = vector.broadcast %cst_16 : f32 to vector<8x1xf32>
    %29 = arith.maximumf %27, %28 : vector<8x1xf32>
    %cst_17 = arith.constant 9.99999974E-6 : f32
    %30 = vector.broadcast %cst_17 : f32 to vector<8x1xf32>
    %31 = arith.addf %29, %30 : vector<8x1xf32>
    %32 = math.rsqrt %31 : vector<8x1xf32>
    %c0_18 = arith.constant 0 : index
    %c0_19 = arith.constant 0 : index
    %33 = vector.load %arg2[%c0_18, %c0_19] : memref<8x1xf32, #tpu.memory_space<vmem>>, vector<8x1xf32>
    %34 = arith.mulf %33, %32 : vector<8x1xf32>
    %c0_20 = arith.constant 0 : index
    %c0_21 = arith.constant 0 : index
    %35 = vector.load %arg3[%c0_20, %c0_21] : memref<8x1xf32, #tpu.memory_space<vmem>>, vector<8x1xf32>
    %36 = arith.mulf %19, %34 : vector<8x1xf32>
    %37 = arith.subf %35, %36 : vector<8x1xf32>
    %38 = vector.broadcast %34 : vector<8x1xf32> to vector<8x16xf32>
    %39 = arith.mulf %38, %0 : vector<8x16xf32>
    %c0_22 = arith.constant 0 : index
    %c0_23 = arith.constant 0 : index
    %c0_24 = arith.constant 0 : index
    %40 = vector.load %arg0[%c0_22, %c0_23, %c0_24] : memref<2x16x256xf32, #tpu.memory_space<vmem>>, vector<1x16x256xf32>
    %41 = vector.shape_cast %40 : vector<1x16x256xf32> to vector<16x256xf32>
    %cst_25 = arith.constant dense<0.000000e+00> : vector<8x256xf32>
    %42 = tpu.matmul %39, %41, %cst_25 {dimension_numbers = #tpu.dot_dimension_numbers<[1], [0], [0], [1], [0, 0, 1, 1], [], []>} : vector<8x16xf32>, vector<16x256xf32>, vector<8x256xf32> -> vector<8x256xf32>
    %43 = vector.broadcast %37 : vector<8x1xf32> to vector<8x256xf32>
    %44 = arith.addf %42, %43 : vector<8x256xf32>
    %c0_26 = arith.constant 0 : index
    %c0_27 = arith.constant 0 : index
    %c0_28 = arith.constant 0 : index
    %45 = vector.load %arg4[%c0_26, %c0_27, %c0_28] : memref<2x8x256xf32, #tpu.memory_space<vmem>>, vector<1x8x256xf32>
    %46 = vector.shape_cast %45 : vector<1x8x256xf32> to vector<8x256xf32>
    %47 = vector.shape_cast %44 : vector<8x256xf32> to vector<1x8x256xf32>
    tpu.vector_store %arg4[%c0_26, %c0_27, %c0_28], %47 {strides = array<i32>} : memref<2x8x256xf32, #tpu.memory_space<vmem>>, vector<1x8x256xf32>,
    %c1_29 = arith.constant 1 : index
    %c0_30 = arith.constant 0 : index
    %c0_31 = arith.constant 0 : index
    %48 = vector.load %arg0[%c1_29, %c0_30, %c0_31] : memref<2x16x256xf32, #tpu.memory_space<vmem>>, vector<1x16x256xf32>
    %49 = vector.shape_cast %48 : vector<1x16x256xf32> to vector<16x256xf32>
    %cst_32 = arith.constant dense<0.000000e+00> : vector<8x256xf32>
    %50 = tpu.matmul %39, %49, %cst_32 {dimension_numbers = #tpu.dot_dimension_numbers<[1], [0], [0], [1], [0, 0, 1, 1], [], []>} : vector<8x16xf32>, vector<16x256xf32>, vector<8x256xf32> -> vector<8x256xf32>
    %51 = vector.broadcast %37 : vector<8x1xf32> to vector<8x256xf32>
    %52 = arith.addf %50, %51 : vector<8x256xf32>
    %c1_33 = arith.constant 1 : index
    %c0_34 = arith.constant 0 : index
    %c0_35 = arith.constant 0 : index
    %53 = vector.load %arg4[%c1_33, %c0_34, %c0_35] : memref<2x8x256xf32, #tpu.memory_space<vmem>>, vector<1x8x256xf32>
    %54 = vector.shape_cast %53 : vector<1x8x256xf32> to vector<8x256xf32>
    %55 = vector.shape_cast %52 : vector<8x256xf32> to vector<1x8x256xf32>
    tpu.vector_store %arg4[%c1_33, %c0_34, %c0_35], %55 {strides = array<i32>} : memref<2x8x256xf32, #tpu.memory_space<vmem>>, vector<1x8x256xf32>,
    return
  }
}

</mosaic_0001>

<bundles_post_ra>
// kernel: tpu_custom_call.1
= control target key start
LH: loop header
LB: loop body
LE: loop exit
PB: predicated region body
PF: predicated region fallthrough
CT: control target
= control target key end

     0   :  { %9 = vsyncpa [#allocation3], 0  ;;  %s706_s0 = inlined_call_operand.hbm [shape: f32[2,16,256], index: 0, kind: input, shape index: {}]   ;;  %s707_s1 = inlined_call_operand.vmem [shape: f32[8,16], index: 1, kind: input, shape index: {}]   ;;  %s708_s2 = inlined_call_operand.vmem [shape: f32[8,1], index: 2, kind: input, shape index: {}]   ;;  %s709_s3 = inlined_call_operand.vmem [shape: f32[8,1], index: 3, kind: input, shape index: {}]   ;;  %s710_s4 = inlined_call_operand.hbm [shape: f32[2,8,256], index: 4, kind: output, shape index: {}]  }
   0x1   :  { %10 = vsyncpa [#allocation4], 0  ;;  %s630_s15 = smov [#allocation2]  }
   0x2   :  { %s16_s16 = sshll.u32 %s630_s15, 4  ;;  %s17_s16 = int_to_ptr.vmem [resolvable:$true] %s16_s16 }
   0x3   :  { %s594_s17 = scalar_lea.vmem %s17_s16, 1024  ;;  %p599_p1 = scmp.lt.s32.totalorder %s17_s16, %s17_s16 }
   0x4   :  { %p595_p0 = scmp.ne.s32.totalorder %s17_s16, %s594_s17  ;;  %p600_p2 = scmp.lt.s32.totalorder %s594_s17, %s594_s17 }
   0x6   :  { %p601_p3 = por %p600_p2, %p599_p1 }
   0x8   :  { %p602_p4 = pnand %p601_p3, %p595_p0 }
   0xa   :  { %605 = shalt.err (!%p602_p4)
}
   0xb   :  { %s631_s18 = smov 256   ;;  %s632_s19 = smov 16  }
   0xc   :  { %22 = dma.hbm_to_vmem [thread:$0]  %s706_s0, 1024, %s17_s16, [#allocation3], %s631_s18, %s631_s18, %s632_s19  }
   0xd   :  { %626 = dma.done.wait [#allocation3], 1024  }
   0xe   :  { %627 = vsyncadd [#allocation3], 4294966272  ;;  %v49_v0 = vld [vmem:[#allocation2 + $0x38] sm:$0xff]  ;;  %v48_v2 = vld [vmem:[#allocation2 + $0x30] sm:$0xff]  ;;  %v633_v12 = vmov 0.0   ;;  %vm634_vm0 = vmmov 0  }
   0xf   :  { %v668_v1 = vld [vmem:[#allocation2 + $0x18] sm:$0xff]  ;;  %78 = vmatprep.subr.mxu0 %v49_v0  ;;  %v671_v3 = vld [vmem:[#allocation2 + $0x10] sm:$0xff]  ;;  %v47_v4 = vld [vmem:[#allocation2 + $0x28] sm:$0xff]  ;;  %v203_v10 = vadd.f32 %v49_v0, %v48_v2  ;;  %vm208_vm1 = vcmask 130048   ;;  %v635_v36 = vmov 0  }
  0x10   :  { %153 = vmatprep.subr.mxu1 %v668_v1  ;;  %v673_v5 = vld [vmem:[#allocation2 + $0x8] sm:$0xff]  ;;  %79 = vmatpush1.xpose.msra.mxu0 %v48_v2  ;;  %v40_v6 = vadd.f32 %v668_v1, %v671_v3  ;;  %v46_v7 = vld [vmem:[#allocation2 + $0x20] sm:$0xff] }
  0x11   :  { %154 = vmatpush1.xpose.msra.mxu1 %v671_v3  ;;  %80 = vmatprep.subr.mxu0 %v47_v4  ;;  %v33_v8 = vld [vmem:[#allocation2] sm:$0xff]  ;;  %v200_v11 = vadd.f32 %v47_v4, %v46_v7 }
  0x12   :  { %155 = vmatprep.subr.mxu1 %v673_v5  ;;  %114 = vmatprep.mubr.f32.mxu0 %v47_v4  ;;  %v37_v9 = vadd.f32 %v673_v5, %v33_v8  ;;  %v32_v24 = vld [vmem:[%s707_s1] sm:$0xff] }
  0x13   :  { %189 = vmatprep.mubr.f32.mxu1 %v673_v5  ;;  %41 = vadd.xlane.f32.xlu0 %v40_v6  ;;  %v364_v44 = vld [vmem:[%s708_s2] sm:$0xff]  ;;  %s636_s2 = smov [#allocation5]  }
  0x14   :  { %81 = vmatpush1.xpose.msra.mxu0 %v46_v7  ;;  %38 = vadd.xlane.f32.xlu1 %v37_v9  ;;  %v366_v47 = vld [vmem:[%s709_s3] sm:$0xff]  ;;  %s539_s26 = sshll.u32 %s636_s2, 4  ;;  %s540_s26 = int_to_ptr.vmem [resolvable:$true] %s539_s26 }
  0x15   :  { %156 = vmatpush1.xpose.msra.mxu1 %v33_v8  ;;  %561 = vmatprep.subr.mxu0 %v633_v12  ;;  %s606_s3 = scalar_lea.vmem %s540_s26, 512  ;;  %p611_p6 = scmp.lt.s32.totalorder %s540_s26, %s540_s26 }
  0x16   :  { %568 = vmatprep.subr.mxu1 %v633_v12  ;;  %582 = vset.pattern.permute.xlu1 %v635_v36  ;;  %p607_p5 = scmp.ne.s32.totalorder %s540_s26, %s606_s3  ;;  %p612_p7 = scmp.lt.s32.totalorder %s606_s3, %s606_s3 }
  0x17   :  { %115 = vmatmul.mubr.f32.vlgmr.msra.gmra.mxu0 %v46_v7  ;;  %204 = vadd.xlane.f32.xlu0 %v203_v10 }
  0x18   :  { %190 = vmatmul.mubr.f32.vlgmr.msra.gmra.mxu1 %v33_v8  ;;  %119 = vmatprep.mubr.f32.mxu0 %v49_v0  ;;  %p613_p8 = por %p612_p7, %p611_p6 }
  0x19   :  { %194 = vmatprep.mubr.f32.mxu1 %v668_v1  ;;  %201 = vadd.xlane.f32.xlu1 %v200_v11 }
  0x1a   :  { %583 = vset.pattern.permute.xlu0 %v635_v36  ;;  %p614_p9 = pnand %p613_p8, %p607_p5 }
  0x1b   :  { %120 = vmatmul.mubr.f32.gmra.mxu0 %v48_v2 }
  0x1c   :  { %195 = vmatmul.mubr.f32.gmra.mxu1 %v671_v3  ;;  %565 = vmatprep.mubr.msk.f32.mxu0 %vm634_vm0, %v633_v12 }
  0x1d   :  { %572 = vmatprep.mubr.msk.f32.mxu1 %vm634_vm0, %v633_v12 }
  0x9c   :  { %v42_v20 = vpop.xlane.xlu0 %41 }
  0x9d   :  { %v39_v25 = vpop.xlane.xlu1 %38 }
  0xa0   :  { %v205_v26 = vpop.xlane.xlu0 %204 }
  0xa1   :  { %v207_v27 = vadd.f32 %v205_v26, %v42_v20 }
  0xa2   :  { %v202_v28 = vpop.xlane.xlu1 %201 }
  0xa3   :  { %562 = vmatpush3.msra.mxu0 %v207_v27  ;;  %v206_v29 = vadd.f32 %v202_v28, %v39_v25 }
  0xa4   :  { %563 = vmatprep.subr.mxu0 %v633_v12 }
  0xa5   :  { %564 = vmatpush3.msra.mxu0 %v206_v29 }
  0xa6   :  { %566 = vmatmul.mubr.msk.f32.vlgmr.msra.gmra.mxu0 %vm208_vm1, %v32_v24  ;;  %411 = vmatprep.subr.mxu0 %v668_v1 }
  0xa7   :  { %412 = vmatpush1.msra.mxu0 %v671_v3  ;;  %447 = vmatprep.mubr.f32.mxu0 %v633_v12 }
  0xa8   :  { %413 = vmatprep.subr.mxu0 %v673_v5 }
  0xa9   :  { %414 = vmatpush1.msra.mxu0 %v33_v8 }
  0xd7   :  { %v116_v13 = vpop.f32.mrf.mxu0 }
  0xd8   :  { %v191_v14 = vpop.f32.mrf.mxu1 }
  0xd9   :  { %v118_v15 = vpop.f32.mrf.mxu0  ;;  %v192_v23 = vadd.f32 %v191_v14, %v116_v13 }
  0xda   :  { %v193_v16 = vpop.f32.mrf.mxu1 }
  0xdb   :  { %v121_v17 = vpop.f32.mrf.mxu0 }
  0xdc   :  { %v196_v18 = vpop.f32.mrf.mxu1 }
  0xdd   :  { %v197_v19 = vadd.f32 %v196_v18, %v121_v17  ;;  %v123_v21 = vpop.f32.mrf.mxu0 }
  0xde   :  { %v198_v22 = vpop.f32.mrf.mxu1 }
  0xdf   :  { %569 = vmatpush3.msra.mxu1 %v197_v19 }
  0xe0   :  { %570 = vmatprep.subr.mxu1 %v633_v12 }
  0xe1   :  { %571 = vmatpush3.msra.mxu1 %v192_v23 }
  0xe2   :  { %573 = vmatmul.mubr.msk.f32.vlgmr.msra.gmra.mxu1 %vm208_vm1, %v32_v24  ;;  %488 = vmatprep.subr.mxu1 %v49_v0 }
  0xe3   :  { %489 = vmatpush1.msra.mxu1 %v48_v2  ;;  %524 = vmatprep.mubr.f32.mxu1 %v633_v12 }
  0xe4   :  { %490 = vmatprep.subr.mxu1 %v47_v4 }
  0xe5   :  { %491 = vmatpush1.msra.mxu1 %v46_v7 }
 0x166   :  { %v278_v34 = vpop.f32.mrf.mxu0 }
 0x167   :  { %v283_v37 = vmul.f32 0.001953125, %v278_v34 }
 0x168   :  { %v567_v35 = vpop.f32.mrf.mxu0 }
 0x169   :  { %v359_v38 = vmul.f32 %v283_v37, %v283_v37 }
 0x1a2   :  { %v350_v30 = vpop.f32.mrf.mxu1 }
 0x1a3   :  { %v354_v31 = vmul.f32 %v350_v30, %v32_v24 }
 0x1a4   :  { %v574_v32 = vpop.f32.mrf.mxu1 }
 0x1a5   :  { %v355_v33 = vsel %vm208_vm1, %v354_v31, 0.0 }
 0x1a6   :  { %356 = vadd.xlane.f32.xlu0 %v355_v33 }
 0x22f   :  { %v357_v39 = vpop.xlane.xlu0 %356 }
 0x230   :  { %v358_v40 = vmul.f32 0.001953125, %v357_v39 }
 0x232   :  { %v360_v41 = vsub.f32 %v358_v40, %v359_v38 }
 0x234   :  { %v361_v42 = vmax.f32 %v360_v41, 0.0 }
 0x236   :  { %v362_v43 = vadd.f32 1e-05, %v361_v42 }
 0x238   :  { %584 = vrsqrt.f32 %v362_v43 }
 0x245   :  { %v585_v45 = vpop.eup %584 }
 0x246   :  { %v365_v46 = vmul.f32 %v585_v45, %v364_v44 }
 0x248   :  { %371 = vperm.xlu1 %582, %v365_v46   ;;  %v367_v48 = vmul.f32 %v365_v46, %v283_v37 }
 0x24a   :  { %v368_v49 = vsub.f32 %v366_v47, %v367_v48 }
 0x24c   :  { %377 = vperm.xlu0 %583, %v368_v49  }
 0x2c3   :  { %v372_v50 = vpop.permute.xlu1 %371 }
 0x2c4   :  { %v374_v51 = vmul.f32 %v372_v50, %v32_v24 }
 0x2c6   :  { %553 = vmatmul.mubr.msk.f32.vlgmr.msra.gmra.mxu0 %vm208_vm1, %v374_v51  ;;  %554 = vmatmul.mubr.msk.f32.vlgmr.msra.gmra.mxu1 %vm208_vm1, %v374_v51 }
 0x2c7   :  { %v378_v52 = vpop.permute.xlu0 %377 }
 0x386   :  { %v449_v53 = vpop.f32.mrf.mxu0  ;;  %v526_v54 = vpop.f32.mrf.mxu1 }
 0x387   :  { %v450_v55 = vadd.f32 %v449_v53, %v378_v52  ;;  %v527_v56 = vadd.f32 %v526_v54, %v378_v52 }
 0x388   :  { %v451_v57 = vpop.f32.mrf.mxu0  ;;  %v528_v58 = vpop.f32.mrf.mxu1 }
 0x389   :  { %454 = vst [vmem:[#allocation5] sm:$0xff] %v450_v55  ;;  %532 = vst [vmem:[#allocation5 + $0x10] sm:$0xff] %v527_v56  ;;  %v452_v59 = vadd.f32 %v451_v57, %v378_v52  ;;  %v529_v60 = vadd.f32 %v528_v58, %v378_v52 }
 0x38b   :  { %455 = vst [vmem:[#allocation5 + $0x8] sm:$0xff] %v452_v59  ;;  %533 = vst [vmem:[#allocation5 + $0x18] sm:$0xff] %v529_v60 }
 0x38c   :  { %617 = shalt.err (!%p614_p9)
}
 0x38d   :  { %545 = dma.vmem_to_hbm [thread:$0]  %s540_s26, 512, %s710_s4, [#allocation4], %s631_s18, %s631_s18, %s632_s19  }
 0x38e   :  { %628 = dma.done.wait [#allocation4], 512  }
 0x38f   :  { %629 = vsyncadd [#allocation4], 4294966784 }
 0x390   :  { %549 = vsyncpa [#allocation3], 1 }
 0x391   :  { %550 = vsyncpa [#allocation4], 1 }

</bundles_post_ra>
